<compile_context>
chip_gen: v7x
topology: tpu7x:2x2x1
jax: 0.10.0
libtpu: 0.0.40
codegen_flags: <defaults>
</compile_context>

<pallas_src>
import jax
import jax.numpy as jnp
from jax.experimental import pallas as pl
from jax.experimental.pallas import tpu as pltpu


def _round_up(x, m):
    return (x + m - 1) // m * m


def mlp_res_net_kernel(xT_ref, hid_ref, w0T_ref, b0T_ref, w1T_ref, b1T_ref,
                       wcT_ref, bcT_ref, outT_ref):
    """One lane-axis batch tile of y^T (transposed layout: batch on lanes).

      xT_ref  : (n_in_pad=8, tb)   compute dtype (f32 or bf16)
      hid_ref : (Wd, 1) f32        1.0 on true hidden rows, 0.0 on passthrough
                                   (x-carrying) rows and zero-padding rows
      w*T_ref : transposed fused weights (compute dtype); b*T biases (f32)
      outT_ref: (n_out_pad=8, tb)  f32
    """
    xT = xT_ref[...]
    wdt = w0T_ref.dtype
    hid = hid_ref[...] != 0.0                       # (Wd, 1) -> broadcasts over lanes

    # Layer 0 fused with identity rows that carry x through (skip branch).
    z = jnp.dot(w0T_ref[...], xT, preferred_element_type=jnp.float32) + b0T_ref[...]
    a = jnp.where(hid, jnp.tanh(z), z)              # f32 tanh/select (v5e-safe)

    # Layer 1: blockdiag(w1, I).  Explicit downcast keeps the MXU on the bf16
    # path when compute_dtype is bf16 (accumulation stays f32).
    z = jnp.dot(w1T_ref[...], a.astype(wdt), preferred_element_type=jnp.float32) + b1T_ref[...]
    a = jnp.where(hid, jnp.tanh(z), z)

    # Output head: stacked [w2; wl], biases pre-summed on the host.
    y = jnp.dot(wcT_ref[...], a.astype(wdt), preferred_element_type=jnp.float32) + bcT_ref[...]
    outT_ref[...] = y.astype(outT_ref.dtype)


def prepare_params(params, *, compute_dtype=jnp.float32):
    """One-time construction of the transposed / padded / fused kernel weights."""
    n_in, H = params["w0"].shape
    n_out = params["w2"].shape[1]
    wdt = compute_dtype

    Wd = _round_up(H + n_in, 128)        # widened hidden state, full lane tiles
    n_in_pad = _round_up(n_in, 8)        # input rows (sublane axis)
    n_out_pad = _round_up(n_out, 8)      # output rows (sublane axis)

    eye = jnp.eye(n_in, dtype=wdt)

    # Layer 0 (transposed): rows [0,H) = w0^T, rows [H,H+n_in) = I (carry x).
    w0T = jnp.zeros((Wd, n_in_pad), wdt)
    w0T = w0T.at[:H, :n_in].set(params["w0"].T.astype(wdt))
    w0T = w0T.at[H:H + n_in, :n_in].set(eye)
    b0T = jnp.zeros((Wd, 1), jnp.float32).at[:H, 0].set(params["b0"].reshape(-1))

    # Layer 1 (transposed): blockdiag(w1^T, I).
    w1T = jnp.zeros((Wd, Wd), wdt)
    w1T = w1T.at[:H, :H].set(params["w1"].T.astype(wdt))
    w1T = w1T.at[H:H + n_in, H:H + n_in].set(eye)
    b1T = jnp.zeros((Wd, 1), jnp.float32).at[:H, 0].set(params["b1"].reshape(-1))

    # Output head (transposed): [w2^T | wl^T]; bias = b2 + bl.
    wcT = jnp.zeros((n_out_pad, Wd), wdt)
    wcT = wcT.at[:n_out, :H].set(params["w2"].T.astype(wdt))
    wcT = wcT.at[:n_out, H:H + n_in].set(params["wl"].T.astype(wdt))
    bcT = jnp.zeros((n_out_pad, 1), jnp.float32).at[:n_out, 0].set(
        (params["b2"] + params["bl"]).reshape(-1))

    # Row mask: 1.0 on true hidden rows (tanh), 0.0 on passthrough/padding.
    hidT = jnp.zeros((Wd, 1), jnp.float32).at[:H, 0].set(1.0)

    return dict(w0T=w0T, b0T=b0T, w1T=w1T, b1T=b1T, wcT=wcT, bcT=bcT,
                hidT=hidT, n_in=n_in, n_out=n_out, H=H)


def mlp_res_net_forward(x, prepped, *, tile_b=2048):
    """x: (B, n_in) f32.  prepped: output of prepare_params.  Returns (B, n_out) f32."""
    B, n_in = x.shape
    assert n_in == prepped["n_in"]
    n_out = prepped["n_out"]
    w0T, b0T = prepped["w0T"], prepped["b0T"]
    w1T, b1T = prepped["w1T"], prepped["b1T"]
    wcT, bcT = prepped["wcT"], prepped["bcT"]
    hidT = prepped["hidT"]
    wdt = w0T.dtype
    Wd, n_in_pad = w0T.shape
    n_out_pad = wcT.shape[0]

    # Batch lives on the lane axis: tiles are multiples of 128 lanes.
    B128 = _round_up(B, 128)
    tb = min(tile_b, B128)
    if B128 >= 256:
        # Keep >= 2 grid steps so the "parallel" axis can shard over both
        # TensorCores on v7x.
        tb = min(tb, _round_up((B128 + 1) // 2, 128))
    tb = max(128, _round_up(tb, 128))
    B_pad = _round_up(B128, tb)
    grid = (B_pad // tb,)

    # x^T padded to (8, B_pad): contiguous lane-major rows -> dense input DMA.
    xT = jnp.zeros((n_in_pad, B_pad), wdt).at[:n_in, :B].set(x.T.astype(wdt))

    def resident(arr):
        # Full-array block with a constant index map -> stays VMEM-resident.
        return pl.BlockSpec(arr.shape, lambda i: (0, 0))

    # VMEM budget: double-buffered x/out tiles + resident weights + f32 temps.
    wbytes = sum(int(a.size) * a.dtype.itemsize
                 for a in (w0T, b0T, w1T, b1T, wcT, bcT, hidT))
    io_bytes = n_in_pad * tb * wdt.itemsize + n_out_pad * tb * 4
    tmp_bytes = 3 * Wd * tb * 4
    vmem_limit = int(min(64 << 20,
                         max(4 * (2 * (wbytes + io_bytes) + tmp_bytes), 32 << 20)))

    cost = pl.CostEstimate(
        flops=2 * B_pad * (n_in_pad * Wd + Wd * Wd + Wd * n_out_pad),
        transcendentals=2 * B_pad * Wd,
        bytes_accessed=int(xT.size) * xT.dtype.itemsize
                       + B_pad * n_out_pad * 4 + wbytes,
    )

    outT = pl.pallas_call(
        mlp_res_net_kernel,
        out_shape=jax.ShapeDtypeStruct((n_out_pad, B_pad), jnp.float32),
        grid=grid,
        in_specs=[
            pl.BlockSpec((n_in_pad, tb), lambda i: (0, i)),   # x^T batch tile
            resident(hidT),
            resident(w0T), resident(b0T),
            resident(w1T), resident(b1T),
            resident(wcT), resident(bcT),
        ],
        out_specs=pl.BlockSpec((n_out_pad, tb), lambda i: (0, i)),
        compiler_params=pltpu.CompilerParams(
            dimension_semantics=("parallel",),
            vmem_limit_bytes=vmem_limit),
        cost_estimate=cost,
    )(xT, hidT, w0T, b0T, w1T, b1T, wcT, bcT)

    return outT[:n_out, :B].T


def init_params(key, n_in=6, n_out=5, n_nodes_per_layer=64, zero_bias=True):
    """nn.Linear-style init: weights U(-1/sqrt(fan_in), 1/sqrt(fan_in)) stored
    (in, out); biases zero (module is built with zero_bias=True)."""
    H = n_nodes_per_layer
    ks = jax.random.split(key, 4)

    def linear_w(k, fan_in, fan_out):
        bound = 1.0 / jnp.sqrt(jnp.float32(fan_in))
        return jax.random.uniform(k, (fan_in, fan_out), jnp.float32, -bound, bound)

    assert zero_bias  # module is constructed with zero_bias=True
    zb = lambda n: jnp.zeros((1, n), jnp.float32)

    return {
        "w0": linear_w(ks[0], n_in, H), "b0": zb(H),
        "w1": linear_w(ks[1], H, H),    "b1": zb(H),
        "w2": linear_w(ks[2], H, n_out), "b2": zb(n_out),
        "wl": linear_w(ks[3], n_in, n_out), "bl": zb(n_out),
    }


def reference_forward(x, p):
    h = jnp.tanh(x @ p["w0"] + p["b0"])
    h = jnp.tanh(h @ p["w1"] + p["b1"])
    return (h @ p["w2"] + p["b2"]) + (x @ p["wl"] + p["bl"])


if __name__ == "__main__":
    key = jax.random.PRNGKey(0)
    k_x, k_x2, k_p = jax.random.split(key, 3)

    B, n_in, n_out, H = 2, 6, 5, 64
    params = init_params(k_p, n_in=n_in, n_out=n_out, n_nodes_per_layer=H)

    # 1) f32 path, tiny batch: strict check against the pure-JAX reference.
    x = jax.random.normal(k_x, (B, n_in), jnp.float32)
    prepped_f32 = prepare_params(params, compute_dtype=jnp.float32)
    out = jax.block_until_ready(mlp_res_net_forward(x, prepped_f32))
    ref = reference_forward(x, params)
    assert out.shape == (B, n_out)
    err = float(jnp.max(jnp.abs(out - ref)))
    assert jnp.allclose(out, ref, atol=1e-5, rtol=1e-5), f"f32 max abs err {err}"

    # 2) bf16 MXU path (v6e/v7x), multi-tile parallel grid: loose smoke check.
    B2 = 512
    x2 = jax.random.normal(k_x2, (B2, n_in), jnp.float32)
    prepped_bf16 = prepare_params(params, compute_dtype=jnp.bfloat16)
    out2 = jax.block_until_ready(mlp_res_net_forward(x2, prepped_bf16, tile_b=256))
    ref2 = reference_forward(x2, params)
    assert out2.shape == (B2, n_out)
    rel = float(jnp.linalg.norm(out2 - ref2) / jnp.linalg.norm(ref2))
    assert rel < 5e-2, f"bf16 relative error {rel}"

    print("KERNEL_OK")
</pallas_src>

<mosaic_0001>
module attributes {stable_mosaic.version = 11 : i64} {
  func.func @mlp_res_net_kernel(%arg0: i32, %arg1: memref<8x128xf32, #tpu.memory_space<vmem>>, %arg2: memref<128x1xf32, #tpu.memory_space<vmem>>, %arg3: memref<128x8xf32, #tpu.memory_space<vmem>>, %arg4: memref<128x1xf32, #tpu.memory_space<vmem>>, %arg5: memref<128x128xf32, #tpu.memory_space<vmem>>, %arg6: memref<128x1xf32, #tpu.memory_space<vmem>>, %arg7: memref<8x128xf32, #tpu.memory_space<vmem>>, %arg8: memref<8x1xf32, #tpu.memory_space<vmem>>, %arg9: memref<8x128xf32, #tpu.memory_space<vmem>>) attributes {dimension_semantics = [#tpu.dimension_semantics<parallel>], iteration_bounds = array<i64: 1>, scalar_prefetch = 0 : i64, scratch_operands = 0 : i64, tpu.core_type = #tpu.core_type<tc>, window_params = [{transform_indices = @transform_0, window_bounds = array<i64: 8, 128>}, {pipeline_mode = #tpu.pipeline_mode<synchronous>, transform_indices = @transform_1, window_bounds = array<i64: 128, 1>}, {pipeline_mode = #tpu.pipeline_mode<synchronous>, transform_indices = @transform_2, window_bounds = array<i64: 128, 8>}, {pipeline_mode = #tpu.pipeline_mode<synchronous>, transform_indices = @transform_3, window_bounds = array<i64: 128, 1>}, {pipeline_mode = #tpu.pipeline_mode<synchronous>, transform_indices = @transform_4, window_bounds = array<i64: 128, 128>}, {pipeline_mode = #tpu.pipeline_mode<synchronous>, transform_indices = @transform_5, window_bounds = array<i64: 128, 1>}, {pipeline_mode = #tpu.pipeline_mode<synchronous>, transform_indices = @transform_6, window_bounds = array<i64: 8, 128>}, {pipeline_mode = #tpu.pipeline_mode<synchronous>, transform_indices = @transform_7, window_bounds = array<i64: 8, 1>}, {transform_indices = @transform_8, window_bounds = array<i64: 8, 128>}]} {
    %c0 = arith.constant 0 : index
    %c0_0 = arith.constant 0 : index
    %0 = vector.load %arg1[%c0, %c0_0] : memref<8x128xf32, #tpu.memory_space<vmem>>, vector<8x128xf32>
    %c0_1 = arith.constant 0 : index
    %c0_2 = arith.constant 0 : index
    %1 = vector.load %arg2[%c0_1, %c0_2] : memref<128x1xf32, #tpu.memory_space<vmem>>, vector<128x1xf32>
    %cst = arith.constant 0.000000e+00 : f32
    %2 = vector.broadcast %cst : f32 to vector<128x1xf32>
    %3 = arith.cmpf one, %1, %2 : vector<128x1xf32>
    %c0_3 = arith.constant 0 : index
    %c0_4 = arith.constant 0 : index
    %4 = vector.load %arg3[%c0_3, %c0_4] : memref<128x8xf32, #tpu.memory_space<vmem>>, vector<128x8xf32>
    %cst_5 = arith.constant dense<0.000000e+00> : vector<128x128xf32>
    %5 = tpu.matmul %4, %0, %cst_5 {dimension_numbers = #tpu.dot_dimension_numbers<[1], [0], [0], [1], [0, 0, 1, 1], [], []>} : vector<128x8xf32>, vector<8x128xf32>, vector<128x128xf32> -> vector<128x128xf32>
    %c0_6 = arith.constant 0 : index
    %c0_7 = arith.constant 0 : index
    %6 = vector.load %arg4[%c0_6, %c0_7] : memref<128x1xf32, #tpu.memory_space<vmem>>, vector<128x1xf32>
    %7 = vector.broadcast %6 : vector<128x1xf32> to vector<128x128xf32>
    %8 = arith.addf %5, %7 : vector<128x128xf32>
    %9 = math.tanh %8 : vector<128x128xf32>
    %10 = vector.shape_cast %3 : vector<128x1xi1> to vector<128x1xi1>
    %11 = vector.broadcast %10 : vector<128x1xi1> to vector<128x128xi1>
    %12 = arith.select %11, %9, %8 : vector<128x128xi1>, vector<128x128xf32>
    %c0_8 = arith.constant 0 : index
    %c0_9 = arith.constant 0 : index
    %13 = vector.load %arg5[%c0_8, %c0_9] : memref<128x128xf32, #tpu.memory_space<vmem>>, vector<128x128xf32>
    %cst_10 = arith.constant dense<0.000000e+00> : vector<128x128xf32>
    %14 = tpu.matmul %13, %12, %cst_10 {dimension_numbers = #tpu.dot_dimension_numbers<[1], [0], [0], [1], [0, 0, 1, 1], [], []>} : vector<128x128xf32>, vector<128x128xf32>, vector<128x128xf32> -> vector<128x128xf32>
    %c0_11 = arith.constant 0 : index
    %c0_12 = arith.constant 0 : index
    %15 = vector.load %arg6[%c0_11, %c0_12] : memref<128x1xf32, #tpu.memory_space<vmem>>, vector<128x1xf32>
    %16 = vector.broadcast %15 : vector<128x1xf32> to vector<128x128xf32>
    %17 = arith.addf %14, %16 : vector<128x128xf32>
    %18 = math.tanh %17 : vector<128x128xf32>
    %19 = vector.shape_cast %3 : vector<128x1xi1> to vector<128x1xi1>
    %20 = vector.broadcast %19 : vector<128x1xi1> to vector<128x128xi1>
    %21 = arith.select %20, %18, %17 : vector<128x128xi1>, vector<128x128xf32>
    %c0_13 = arith.constant 0 : index
    %c0_14 = arith.constant 0 : index
    %22 = vector.load %arg7[%c0_13, %c0_14] : memref<8x128xf32, #tpu.memory_space<vmem>>, vector<8x128xf32>
    %cst_15 = arith.constant dense<0.000000e+00> : vector<8x128xf32>
    %23 = tpu.matmul %22, %21, %cst_15 {dimension_numbers = #tpu.dot_dimension_numbers<[1], [0], [0], [1], [0, 0, 1, 1], [], []>} : vector<8x128xf32>, vector<128x128xf32>, vector<8x128xf32> -> vector<8x128xf32>
    %c0_16 = arith.constant 0 : index
    %c0_17 = arith.constant 0 : index
    %24 = vector.load %arg8[%c0_16, %c0_17] : memref<8x1xf32, #tpu.memory_space<vmem>>, vector<8x1xf32>
    %25 = vector.broadcast %24 : vector<8x1xf32> to vector<8x128xf32>
    %26 = arith.addf %23, %25 : vector<8x128xf32>
    %c0_18 = arith.constant 0 : index
    %c0_19 = arith.constant 0 : index
    %27 = vector.load %arg9[%c0_18, %c0_19] : memref<8x128xf32, #tpu.memory_space<vmem>>, vector<8x128xf32>
    tpu.vector_store %arg9[%c0_18, %c0_19], %26 {strides = array<i32>} : memref<8x128xf32, #tpu.memory_space<vmem>>, vector<8x128xf32>,
    return
  }
  func.func @transform_0(%arg0: i32) -> (i32, i32) {
    %c0_i32 = arith.constant 0 : i32
    %c0_i32_0 = arith.constant 0 : i32
    return %c0_i32, %arg0 : i32, i32
  }
  func.func @transform_1(%arg0: i32) -> (i32, i32) {
    %c0_i32 = arith.constant 0 : i32
    %c0_i32_0 = arith.constant 0 : i32
    %c0_i32_1 = arith.constant 0 : i32
    return %c0_i32, %c0_i32_0 : i32, i32
  }
  func.func @transform_2(%arg0: i32) -> (i32, i32) {
    %c0_i32 = arith.constant 0 : i32
    %c0_i32_0 = arith.constant 0 : i32
    %c0_i32_1 = arith.constant 0 : i32
    return %c0_i32, %c0_i32_0 : i32, i32
  }
  func.func @transform_3(%arg0: i32) -> (i32, i32) {
    %c0_i32 = arith.constant 0 : i32
    %c0_i32_0 = arith.constant 0 : i32
    %c0_i32_1 = arith.constant 0 : i32
    return %c0_i32, %c0_i32_0 : i32, i32
  }
  func.func @transform_4(%arg0: i32) -> (i32, i32) {
    %c0_i32 = arith.constant 0 : i32
    %c0_i32_0 = arith.constant 0 : i32
    %c0_i32_1 = arith.constant 0 : i32
    return %c0_i32, %c0_i32_0 : i32, i32
  }
  func.func @transform_5(%arg0: i32) -> (i32, i32) {
    %c0_i32 = arith.constant 0 : i32
    %c0_i32_0 = arith.constant 0 : i32
    %c0_i32_1 = arith.constant 0 : i32
    return %c0_i32, %c0_i32_0 : i32, i32
  }
  func.func @transform_6(%arg0: i32) -> (i32, i32) {
    %c0_i32 = arith.constant 0 : i32
    %c0_i32_0 = arith.constant 0 : i32
    %c0_i32_1 = arith.constant 0 : i32
    return %c0_i32, %c0_i32_0 : i32, i32
  }
  func.func @transform_7(%arg0: i32) -> (i32, i32) {
    %c0_i32 = arith.constant 0 : i32
    %c0_i32_0 = arith.constant 0 : i32
    %c0_i32_1 = arith.constant 0 : i32
    return %c0_i32, %c0_i32_0 : i32, i32
  }
  func.func @transform_8(%arg0: i32) -> (i32, i32) {
    %c0_i32 = arith.constant 0 : i32
    %c0_i32_0 = arith.constant 0 : i32
    return %c0_i32, %arg0 : i32, i32
  }
}

</mosaic_0001>

<bundles_post_ra>
// kernel: tpu_custom_call.1
= control target key start
LH: loop header
LB: loop body
LE: loop exit
PB: predicated region body
PF: predicated region fallthrough
CT: control target
= control target key end

     0   :  { %v1212_v3 = vmov 0   ;;  %vm175_vm0 = vcmask 64512   ;;  %s1686_s0 = inlined_call_operand.vmem [shape: f32[8,128], index: 0, kind: input, shape index: {}]   ;;  %s1687_s1 = inlined_call_operand.vmem [shape: f32[128,1], index: 1, kind: input, shape index: {}]   ;;  %s1688_s2 = inlined_call_operand.vmem [shape: f32[128,8], index: 2, kind: input, shape index: {}]   ;;  %s1689_s3 = inlined_call_operand.vmem [shape: f32[128,1], index: 3, kind: input, shape index: {}]   ;;  %s1690_s4 = inlined_call_operand.vmem [shape: f32[128,128], index: 4, kind: input, shape index: {}]   ;;  %s1691_s5 = inlined_call_operand.vmem [shape: f32[128,1], index: 5, kind: input, shape index: {}]   ;;  %s1692_s6 = inlined_call_operand.vmem [shape: f32[8,128], index: 6, kind: input, shape index: {}]   ;;  %s1693_s7 = inlined_call_operand.vmem [shape: f32[8,1], index: 7, kind: input, shape index: {}]   ;;  %s1694_s8 = inlined_call_operand.hbm [shape: f32[8,128], index: 8, kind: output, shape index: {}]  }
   0x1   :  { %v30_v0 = vld [vmem:[%s1686_s0] sm:$0xff]  ;;  %v81_v1 = vld [vmem:[%s1689_s3 + $0x10] sm:$0xff]  ;;  %1123 = vset.pattern.permute.xlu1 %v1212_v3  ;;  %1122 = vset.pattern.permute.xlu0 %v1212_v3  ;;  %v64_v5 = vld [vmem:[%s1688_s2 + $0x8] sm:$0xff] }
   0x2   :  { %v79_v2 = vld [vmem:[%s1689_s3] sm:$0xff]  ;;  %944 = vmatprep.subr.mxu0 %v30_v0  ;;  %107 = vperm.xlu1 %1123, %v81_v1   ;;  %v82_v6 = vld [vmem:[%s1689_s3 + $0x18] sm:$0xff]  ;;  %v65_v7 = vld [vmem:[%s1688_s2 + $0x10] sm:$0xff] }
   0x3   :  { %v63_v4 = vld [vmem:[%s1688_s2] sm:$0xff]  ;;  %97 = vperm.xlu0 %1122, %v79_v2   ;;  %945 = vmatpush3.msra.mxu0 %v30_v0  ;;  %v80_v8 = vld [vmem:[%s1689_s3 + $0x8] sm:$0xff]  ;;  %v66_v9 = vld [vmem:[%s1688_s2 + $0x18] sm:$0xff] }
   0x4   :  { %946 = vmatprep.mubr.msk.f32.mxu0 %vm175_vm0, %v63_v4  ;;  %v84_v10 = vld [vmem:[%s1689_s3 + $0x28] sm:$0xff]  ;;  %v67_v11 = vld [vmem:[%s1688_s2 + $0x20] sm:$0xff]  ;;  %v86_v16 = vld [vmem:[%s1689_s3 + $0x38] sm:$0xff] }
   0x5   :  { %947 = vmatmul.mubr.msk.f32.vlgmr.msra.gmra.mrb[0].mxu0 %vm175_vm0, %v64_v5  ;;  %v83_v12 = vld [vmem:[%s1689_s3 + $0x20] sm:$0xff]  ;;  %v32_v13 = vld [vmem:[%s1687_s1 + $0x8] sm:$0xff]  ;;  %v69_v17 = vld [vmem:[%s1688_s2 + $0x30] sm:$0xff] }
   0x6   :  { %112 = vperm.xlu1 %1123, %v82_v6   ;;  %949 = vmatprep.mubr.msk.f32.mxu0 %vm175_vm0, %v65_v7  ;;  %v68_v14 = vld [vmem:[%s1688_s2 + $0x28] sm:$0xff]  ;;  %v31_v15 = vld [vmem:[%s1687_s1] sm:$0xff]  ;;  %v85_v18 = vld [vmem:[%s1689_s3 + $0x30] sm:$0xff]  ;;  %vm48_vm1 = vcmp.ne.f32.partialorder %v32_v13, 0.0 }
   0x7   :  { %102 = vperm.xlu0 %1122, %v80_v8   ;;  %vm47_vm2 = vcmp.ne.f32.partialorder %v31_v15, 0.0  ;;  %v70_v19 = vld [vmem:[%s1688_s2 + $0x38] sm:$0xff]  ;;  %v386_v20 = vsel %vm48_vm1, 1, %v1212_v3  ;;  %v71_v21 = vld [vmem:[%s1688_s2 + $0x40] sm:$0xff]  ;;  %v72_v24 = vld [vmem:[%s1688_s2 + $0x48] sm:$0xff] }
   0x8   :  { %v385_v22 = vsel %vm47_vm2, 1, %v1212_v3  ;;  %v34_v23 = vld [vmem:[%s1687_s1 + $0x18] sm:$0xff]  ;;  %v33_v25 = vld [vmem:[%s1687_s1 + $0x10] sm:$0xff]  ;;  %v88_v26 = vld [vmem:[%s1689_s3 + $0x48] sm:$0xff] }
   0x9   :  { %950 = vmatmul.mubr.msk.f32.gmra.mrb[2].mxu0 %vm175_vm0, %v66_v9  ;;  %v73_v27 = vld [vmem:[%s1688_s2 + $0x50] sm:$0xff]  ;;  %v87_v28 = vld [vmem:[%s1689_s3 + $0x40] sm:$0xff]  ;;  %vm50_vm3 = vcmp.ne.f32.partialorder %v34_v23, 0.0  ;;  %vm49_vm4 = vcmp.ne.f32.partialorder %v33_v25, 0.0  ;;  %v74_v29 = vld [vmem:[%s1688_s2 + $0x58] sm:$0xff] }
   0xa   :  { %122 = vperm.xlu1 %1123, %v84_v10   ;;  %952 = vmatprep.mubr.msk.f32.mxu0 %vm175_vm0, %v67_v11  ;;  %v388_v30 = vsel %vm50_vm3, 1, %v1212_v3  ;;  %v75_v31 = vld [vmem:[%s1688_s2 + $0x60] sm:$0xff] }
   0xb   :  { %117 = vperm.xlu0 %1122, %v83_v12  }
   0xd   :  { %953 = vmatmul.mubr.msk.f32.gmra.mrb[4].mxu0 %vm175_vm0, %v68_v14 }
   0xe   :  { %132 = vperm.xlu1 %1123, %v86_v16   ;;  %955 = vmatprep.mubr.msk.f32.mxu0 %vm175_vm0, %v69_v17 }
   0xf   :  { %127 = vperm.xlu0 %1122, %v85_v18  }
  0x11   :  { %956 = vmatmul.mubr.msk.f32.gmra.mrb[6].mxu0 %vm175_vm0, %v70_v19 }
  0x12   :  { %405 = vperm.xlu1 %1123, %v386_v20   ;;  %958 = vmatprep.mubr.msk.f32.mxu0 %vm175_vm0, %v71_v21 }
  0x13   :  { %402 = vperm.xlu0 %1122, %v385_v22  }
  0x15   :  { %959 = vmatmul.mubr.msk.f32.gmra.mrb[8].mxu0 %vm175_vm0, %v72_v24 }
  0x16   :  { %142 = vperm.xlu1 %1123, %v88_v26   ;;  %961 = vmatprep.mubr.msk.f32.mxu0 %vm175_vm0, %v73_v27 }
  0x17   :  { %137 = vperm.xlu0 %1122, %v87_v28  }
  0x18   :  { %13 = vsyncpa [#allocation3], 0  ;;  %v387_v32 = vsel %vm49_vm4, 1, %v1212_v3  ;;  %v36_v33 = vld [vmem:[%s1687_s1 + $0x28] sm:$0xff]  ;;  %v35_v35 = vld [vmem:[%s1687_s1 + $0x20] sm:$0xff]  ;;  %s1216_s17 = smov [#allocation2]  }
  0x19   :  { %962 = vmatmul.mubr.msk.f32.gmra.mrb[10].mxu0 %vm175_vm0, %v74_v29  ;;  %v76_v34 = vld [vmem:[%s1688_s2 + $0x68] sm:$0xff]  ;;  %v90_v36 = vld [vmem:[%s1689_s3 + $0x58] sm:$0xff]  ;;  %v77_v37 = vld [vmem:[%s1688_s2 + $0x70] sm:$0xff]  ;;  %vm52_vm5 = vcmp.ne.f32.partialorder %v36_v33, 0.0  ;;  %vm51_vm6 = vcmp.ne.f32.partialorder %v35_v35, 0.0  ;;  %s854_s18 = sshll.u32 %s1216_s17, 4  ;;  %s855_s18 = int_to_ptr.vmem [resolvable:$true] %s854_s18 }
  0x1a   :  { %411 = vperm.xlu1 %1123, %v388_v30   ;;  %964 = vmatprep.mubr.msk.f32.mxu0 %vm175_vm0, %v75_v31  ;;  %v89_v38 = vld [vmem:[%s1689_s3 + $0x50] sm:$0xff]  ;;  %v78_v39 = vld [vmem:[%s1688_s2 + $0x78] sm:$0xff]  ;;  %v390_v40 = vsel %vm52_vm5, 1, %v1212_v3  ;;  %v389_v41 = vsel %vm51_vm6, 1, %v1212_v3  ;;  %v92_v44 = vld [vmem:[%s1689_s3 + $0x68] sm:$0xff]  ;;  %s1188_s19 = scalar_lea.vmem %s855_s18, 128  ;;  %p1193_p1 = scmp.lt.s32.totalorder %s855_s18, %s855_s18 }
  0x1b   :  { %408 = vperm.xlu0 %1122, %v387_v32   ;;  %v38_v42 = vld [vmem:[%s1687_s1 + $0x38] sm:$0xff]  ;;  %v37_v43 = vld [vmem:[%s1687_s1 + $0x30] sm:$0xff]  ;;  %v91_v45 = vld [vmem:[%s1689_s3 + $0x60] sm:$0xff]  ;;  %p1189_p0 = scmp.ne.s32.totalorder %s855_s18, %s1188_s19  ;;  %p1194_p2 = scmp.lt.s32.totalorder %s1188_s19, %s1188_s19 }
  0x1c   :  { %vm54_vm7 = vcmp.ne.f32.partialorder %v38_v42, 0.0  ;;  %vm53_vm8 = vcmp.ne.f32.partialorder %v37_v43, 0.0  ;;  %v40_v48 = vld [vmem:[%s1687_s1 + $0x48] sm:$0xff]  ;;  %v39_v49 = vld [vmem:[%s1687_s1 + $0x40] sm:$0xff]  ;;  %v94_v50 = vld [vmem:[%s1689_s3 + $0x78] sm:$0xff] }
  0x1d   :  { %965 = vmatmul.mubr.msk.f32.gmra.mrb[12].mxu0 %vm175_vm0, %v76_v34  ;;  %v392_v46 = vsel %vm54_vm7, 1, %v1212_v3  ;;  %v391_v47 = vsel %vm53_vm8, 1, %v1212_v3  ;;  %v93_v51 = vld [vmem:[%s1689_s3 + $0x70] sm:$0xff]  ;;  %vm56_vm9 = vcmp.ne.f32.partialorder %v40_v48, 0.0  ;;  %vm55_vm10 = vcmp.ne.f32.partialorder %v39_v49, 0.0  ;;  %v42_v52 = vld [vmem:[%s1687_s1 + $0x58] sm:$0xff]  ;;  %p1195_p3 = por %p1194_p2, %p1193_p1 }
  0x1e   :  { %152 = vperm.xlu1 %1123, %v90_v36   ;;  %967 = vmatprep.mubr.msk.f32.mxu0 %vm175_vm0, %v77_v37  ;;  %v41_v53 = vld [vmem:[%s1687_s1 + $0x50] sm:$0xff]  ;;  %v394_v54 = vsel %vm56_vm9, 1, %v1212_v3  ;;  %v393_v55 = vsel %vm55_vm10, 1, %v1212_v3  ;;  %vm58_vm11 = vcmp.ne.f32.partialorder %v42_v52, 0.0  ;;  %v44_v56 = vld [vmem:[%s1687_s1 + $0x68] sm:$0xff]  ;;  %v43_v57 = vld [vmem:[%s1687_s1 + $0x60] sm:$0xff] }
  0x1f   :  { %147 = vperm.xlu0 %1122, %v89_v38   ;;  %vm57_vm12 = vcmp.ne.f32.partialorder %v41_v53, 0.0  ;;  %v396_v58 = vsel %vm58_vm11, 1, %v1212_v3  ;;  %vm60_vm13 = vcmp.ne.f32.partialorder %v44_v56, 0.0  ;;  %vm59_vm14 = vcmp.ne.f32.partialorder %v43_v57, 0.0  ;;  %v46_v60 = vld [vmem:[%s1687_s1 + $0x78] sm:$0xff]  ;;  %v45_v61 = vld [vmem:[%s1687_s1 + $0x70] sm:$0xff]  ;;  %p1196_p4 = pnand %p1195_p3, %p1189_p0 }
  0x20   :  { %v395_v59 = vsel %vm57_vm12, 1, %v1212_v3  ;;  %v398_v62 = vsel %vm60_vm13, 1, %v1212_v3  ;;  %v397_v63 = vsel %vm59_vm14, 1, %v1212_v3  ;;  %vm62_vm15 = vcmp.ne.f32.partialorder %v46_v60, 0.0  ;;  %v498_v2 = vld [vmem:[%s1691_s5 + $0x8] sm:$0xff]  ;;  %v497_v4 = vld [vmem:[%s1691_s5] sm:$0xff] }
  0x21   :  { %968 = vmatmul.mubr.msk.f32.gmra.mrb[14].mxu0 %vm175_vm0, %v78_v39  ;;  %vm61_vm0 = vcmp.ne.f32.partialorder %v45_v61, 0.0  ;;  %v400_v0 = vsel %vm62_vm15, 1, %v1212_v3  ;;  %v500_v5 = vld [vmem:[%s1691_s5 + $0x18] sm:$0xff]  ;;  %v502_v6 = vld [vmem:[%s1691_s5 + $0x28] sm:$0xff]  ;;  %v501_v7 = vld [vmem:[%s1691_s5 + $0x20] sm:$0xff] }
  0x22   :  { %417 = vperm.xlu1 %1123, %v390_v40   ;;  %v399_v1 = vsel %vm61_vm0, 1, %v1212_v3  ;;  %v499_v3 = vld [vmem:[%s1691_s5 + $0x10] sm:$0xff]  ;;  %v504_v8 = vld [vmem:[%s1691_s5 + $0x38] sm:$0xff]  ;;  %v506_v10 = vld [vmem:[%s1691_s5 + $0x48] sm:$0xff] }
  0x23   :  { %414 = vperm.xlu0 %1122, %v389_v41   ;;  %v503_v9 = vld [vmem:[%s1691_s5 + $0x30] sm:$0xff]  ;;  %v505_v11 = vld [vmem:[%s1691_s5 + $0x40] sm:$0xff]  ;;  %v508_v12 = vld [vmem:[%s1691_s5 + $0x58] sm:$0xff] }
  0x24   :  { %v507_v13 = vld [vmem:[%s1691_s5 + $0x50] sm:$0xff]  ;;  %v510_v14 = vld [vmem:[%s1691_s5 + $0x68] sm:$0xff]  ;;  %v509_v15 = vld [vmem:[%s1691_s5 + $0x60] sm:$0xff] }
  0x25   :  { %v512_v16 = vld [vmem:[%s1691_s5 + $0x78] sm:$0xff]  ;;  %v511_v17 = vld [vmem:[%s1691_s5 + $0x70] sm:$0xff]  ;;  %v771_v18 = vld [vmem:[%s1693_s7] sm:$0xff] }
  0x26   :  { %162 = vperm.xlu1 %1123, %v92_v44   ;;  %v481_v19 = vld [vmem:[%s1690_s4] sm:$0xff] }
  0x27   :  { %157 = vperm.xlu0 %1122, %v91_v45   ;;  %1002 = vmatprep.mubr.f32.mxu1 %v481_v19 }
  0x2a   :  { %423 = vperm.xlu1 %1123, %v392_v46  }
  0x2b   :  { %420 = vperm.xlu0 %1122, %v391_v47  }
  0x2e   :  { %172 = vperm.xlu1 %1123, %v94_v50  }
  0x2f   :  { %167 = vperm.xlu0 %1122, %v93_v51  }
  0x32   :  { %429 = vperm.xlu1 %1123, %v394_v54  }
  0x33   :  { %426 = vperm.xlu0 %1122, %v393_v55  }
  0x36   :  { %435 = vperm.xlu1 %1123, %v396_v58  }
  0x37   :  { %432 = vperm.xlu0 %1122, %v395_v59  }
  0x3a   :  { %441 = vperm.xlu1 %1123, %v398_v62  }
  0x3b   :  { %438 = vperm.xlu0 %1122, %v397_v63  }
  0x3e   :  { %447 = vperm.xlu1 %1123, %v400_v0  }
  0x3f   :  { %444 = vperm.xlu0 %1122, %v399_v1  }
  0x42   :  { %520 = vperm.xlu1 %1123, %v498_v2  }
  0x43   :  { %515 = vperm.xlu0 %1122, %v497_v4  }
  0x46   :  { %530 = vperm.xlu1 %1123, %v500_v5  }
  0x47   :  { %525 = vperm.xlu0 %1122, %v499_v3  }
  0x4a   :  { %540 = vperm.xlu1 %1123, %v502_v6  }
  0x4b   :  { %535 = vperm.xlu0 %1122, %v501_v7  }
  0x4e   :  { %550 = vperm.xlu1 %1123, %v504_v8  }
  0x4f   :  { %545 = vperm.xlu0 %1122, %v503_v9  }
  0x52   :  { %560 = vperm.xlu1 %1123, %v506_v10  }
  0x53   :  { %555 = vperm.xlu0 %1122, %v505_v11  }
  0x56   :  { %570 = vperm.xlu1 %1123, %v508_v12  }
  0x57   :  { %565 = vperm.xlu0 %1122, %v507_v13  }
  0x5a   :  { %580 = vperm.xlu1 %1123, %v510_v14  }
  0x5b   :  { %575 = vperm.xlu0 %1122, %v509_v15  }
  0x5e   :  { %590 = vperm.xlu1 %1123, %v512_v16  }
  0x5f   :  { %585 = vperm.xlu0 %1122, %v511_v17  }
  0x63   :  { %774 = vperm.xlu0 %1122, %v771_v18  }
  0x81   :  { %v108_v20 = vpop.permute.xlu1 %107 }
  0x82   :  { %v98_v21 = vpop.permute.xlu0 %97 }
  0x85   :  { %v113_v22 = vpop.permute.xlu1 %112 }
  0x86   :  { %v103_v23 = vpop.permute.xlu0 %102 }
  0x89   :  { %v123_v24 = vpop.permute.xlu1 %122 }
  0x8a   :  { %v118_v25 = vpop.permute.xlu0 %117 }
  0x8d   :  { %v133_v26 = vpop.permute.xlu1 %132 }
  0x8e   :  { %v128_v27 = vpop.permute.xlu0 %127 }
  0x91   :  { %v1497_v28 = vpop.permute.xlu1 %405 }
  0x92   :  { %v1499_v29 = vpop.permute.xlu0 %402  ;;  %vm450_vm1 = vcmp.eq.s32.totalorder %v1497_v28, 1 }
  0x93   :  { %vm449_vm2 = vcmp.eq.s32.totalorder %v1499_v29, 1 }
  0x95   :  { %v143_v30 = vpop.permute.xlu1 %142 }
  0x96   :  { %v138_v31 = vpop.permute.xlu0 %137 }
  0x99   :  { %v1501_v32 = vpop.permute.xlu1 %411 }
  0x9a   :  { %v1503_v33 = vpop.permute.xlu0 %408  ;;  %vm452_vm3 = vcmp.eq.s32.totalorder %v1501_v32, 1 }
  0x9b   :  { %vm451_vm4 = vcmp.eq.s32.totalorder %v1503_v33, 1 }
  0x9d   :  { %v153_v34 = vpop.permute.xlu1 %152 }
  0x9e   :  { %v1505_v35 = vpop.permute.xlu0 %147 }
  0xa1   :  { %v1507_v36 = vpop.permute.xlu1 %417 }
  0xa2   :  { %v1509_v37 = vpop.permute.xlu0 %414  ;;  %vm454_vm5 = vcmp.eq.s32.totalorder %v1507_v36, 1 }
  0xa3   :  { %vm453_vm6 = vcmp.eq.s32.totalorder %v1509_v37, 1 }
  0xa5   :  { %v1511_v42 = vpop.permute.xlu1 %162 }
  0xa6   :  { %v1513_v44 = vpop.permute.xlu0 %157 }
  0xa9   :  { %v1515_v51 = vpop.permute.xlu1 %423 }
  0xaa   :  { %v1517_v53 = vpop.permute.xlu0 %420  ;;  %vm456_vm7 = vcmp.eq.s32.totalorder %v1515_v51, 1 }
  0xab   :  { %vm455_vm8 = vcmp.eq.s32.totalorder %v1517_v53, 1 }
  0xad   :  { %v173_v62 = vpop.permute.xlu1 %172 }
  0xae   :  { %v168_v2 = vpop.permute.xlu0 %167 }
  0xb1   :  { %v1533_v15 = vpop.permute.xlu1 %429 }
  0xb2   :  { %v1538_v18 = vpop.permute.xlu0 %426  ;;  %vm458_vm9 = vcmp.eq.s32.totalorder %v1533_v15, 1 }
  0xb3   :  { %vm457_vm10 = vcmp.eq.s32.totalorder %v1538_v18, 1 }
  0xd8   :  { %v948_v38 = vpop.f32.mrb[0].mxu0 }
  0xd9   :  { %v296_v39 = vadd.f32 %v948_v38, %v103_v23  ;;  %v290_v40 = vpop.f32.mrb[1].mxu0 }
  0xda   :  { %v291_v41 = vadd.f32 %v290_v40, %v98_v21 }
  0xdb   :  { %1124 = vtanh.f32 %v296_v39 }
  0xdc   :  { %1126 = vtanh.f32 %v291_v41  ;;  %v951_v43 = vpop.f32.mrb[2].mxu0 }
  0xdd   :  { %v306_v45 = vadd.f32 %v951_v43, %v113_v22  ;;  %v300_v46 = vpop.f32.mrb[3].mxu0 }
  0xde   :  { %v301_v47 = vadd.f32 %v300_v46, %v108_v20 }
  0xdf   :  { %1128 = vtanh.f32 %v306_v45 }
  0xe0   :  { %1130 = vtanh.f32 %v301_v47  ;;  %v954_v48 = vpop.f32.mrb[4].mxu0 }
  0xe1   :  { %v316_v49 = vadd.f32 %v954_v48, %v123_v24  ;;  %v310_v50 = vpop.f32.mrb[5].mxu0 }
  0xe2   :  { %v311_v52 = vadd.f32 %v310_v50, %v118_v25 }
  0xe3   :  { %1132 = vtanh.f32 %v316_v49 }
  0xe4   :  { %1134 = vtanh.f32 %v311_v52  ;;  %v957_v54 = vpop.f32.mrb[6].mxu0 }
  0xe5   :  { %v1125_v55 = vpop.eup %1124  ;;  %v326_v56 = vadd.f32 %v957_v54, %v133_v26  ;;  %v320_v57 = vpop.f32.mrb[7].mxu0 }
  0xe6   :  { %v1127_v58 = vpop.eup %1126  ;;  %v321_v59 = vadd.f32 %v320_v57, %v128_v27  ;;  %v466_v60 = vsel %vm450_vm1, %v1125_v55, %v296_v39  ;;  %v1553_v39 = vpop.permute.xlu0 %432 }
  0xe7   :  { %1136 = vtanh.f32 %v326_v56  ;;  %v465_v61 = vsel %vm449_vm2, %v1127_v58, %v291_v41  ;;  %vm459_vm12 = vcmp.eq.s32.totalorder %v1553_v39, 1 }
  0xe8   :  { %1138 = vtanh.f32 %v321_v59  ;;  %v960_v63 = vpop.f32.mrb[8].mxu0  ;;  %v1061_v0 = vpack.c.bf16 %v466_v60, %v465_v61 }
  0xe9   :  { %v1129_v1 = vpop.eup %1128  ;;  %v336_v4 = vadd.f32 %v960_v63, %v143_v30  ;;  %v330_v5 = vpop.f32.mrb[9].mxu0 }
  0xea   :  { %v1131_v3 = vpop.eup %1130  ;;  %v331_v6 = vadd.f32 %v330_v5, %v138_v31  ;;  %1062 = vmatprep.subr.bf16.mxu1 %v1061_v0  ;;  %v468_v7 = vsel %vm452_vm3, %v1129_v1, %v306_v45  ;;  %v1550_v31 = vpop.permute.xlu1 %435  ;;  %v482_v5 = vld [vmem:[%s1690_s4 + $0x8] sm:$0xff] }
  0xeb   :  { %1140 = vtanh.f32 %v336_v4  ;;  %1064 = vmatpush3.bf16.msra.mxu1 %v1061_v0  ;;  %v467_v8 = vsel %vm451_vm4, %v1131_v3, %v301_v47  ;;  %vm460_vm11 = vcmp.eq.s32.totalorder %v1550_v31, 1  ;;  %v483_v3 = vld [vmem:[%s1690_s4 + $0x10] sm:$0xff] }
  0xec   :  { %1142 = vtanh.f32 %v331_v6  ;;  %v963_v9 = vpop.f32.mrb[10].mxu0  ;;  %v1065_v10 = vpack.c.bf16 %v468_v7, %v467_v8  ;;  %v485_v7 = vld [vmem:[%s1690_s4 + $0x20] sm:$0xff]  ;;  %v486_v8 = vld [vmem:[%s1690_s4 + $0x28] sm:$0xff] }
  0xed   :  { %v1133_v11 = vpop.eup %1132  ;;  %v346_v12 = vadd.f32 %v963_v9, %v153_v34  ;;  %v340_v13 = vpop.f32.mrb[11].mxu0  ;;  %v487_v9 = vld [vmem:[%s1690_s4 + $0x30] sm:$0xff] }
  0xee   :  { %v1135_v14 = vpop.eup %1134  ;;  %v341_v16 = vadd.f32 %v340_v13, %v1505_v35  ;;  %1066 = vmatprep.subr.bf16.mxu1 %v1065_v10  ;;  %v470_v17 = vsel %vm454_vm5, %v1133_v11, %v316_v49  ;;  %v1562_v49 = vpop.permute.xlu1 %441  ;;  %v489_v11 = vld [vmem:[%s1690_s4 + $0x40] sm:$0xff]  ;;  %v491_v13 = vld [vmem:[%s1690_s4 + $0x50] sm:$0xff] }
  0xef   :  { %1144 = vtanh.f32 %v346_v12  ;;  %1068 = vmatpush3.bf16.msra.mxu1 %v1065_v10  ;;  %v469_v19 = vsel %vm453_vm6, %v1135_v14, %v311_v52  ;;  %v1566_v52 = vpop.permute.xlu0 %438  ;;  %vm462_vm13 = vcmp.eq.s32.totalorder %v1562_v49, 1  ;;  %v488_v10 = vld [vmem:[%s1690_s4 + $0x38] sm:$0xff] }
  0xf0   :  { %1146 = vtanh.f32 %v341_v16  ;;  %v966_v20 = vpop.f32.mrb[12].mxu0  ;;  %v1069_v21 = vpack.c.bf16 %v470_v17, %v469_v19  ;;  %vm461_vm14 = vcmp.eq.s32.totalorder %v1566_v52, 1  ;;  %v492_v14 = vld [vmem:[%s1690_s4 + $0x58] sm:$0xff]  ;;  %v494_v17 = vld [vmem:[%s1690_s4 + $0x68] sm:$0xff]  ;;  %v495_v19 = vld [vmem:[%s1690_s4 + $0x70] sm:$0xff] }
  0xf1   :  { %v1137_v22 = vpop.eup %1136  ;;  %v356_v23 = vadd.f32 %v966_v20, %v1511_v42  ;;  %v350_v24 = vpop.f32.mrb[13].mxu0  ;;  %v496_v20 = vld [vmem:[%s1690_s4 + $0x78] sm:$0xff]  ;;  %v770_v52 = vld [vmem:[%s1692_s6] sm:$0xff] }
  0xf2   :  { %v1139_v25 = vpop.eup %1138  ;;  %v351_v26 = vadd.f32 %v350_v24, %v1513_v44  ;;  %1070 = vmatprep.subr.bf16.mxu1 %v1069_v21  ;;  %v472_v27 = vsel %vm456_vm7, %v1137_v22, %v326_v56  ;;  %v1576_v60 = vpop.permute.xlu1 %447  ;;  %v1215_v22 = vmov 0.0  }
  0xf3   :  { %1148 = vtanh.f32 %v356_v23  ;;  %1072 = vmatpush3.bf16.msra.mxu1 %v1069_v21  ;;  %v471_v30 = vsel %vm455_vm8, %v1139_v25, %v321_v59  ;;  %vm464_vm15 = vcmp.eq.s32.totalorder %v1576_v60, 1  ;;  %v1579_v63 = vpop.permute.xlu0 %444  ;;  %v1213_v21 = vmov 0.0|0.0  }
  0xf4   :  { %1150 = vtanh.f32 %v351_v26  ;;  %v969_v34 = vpop.f32.mrb[14].mxu0  ;;  %v1073_v35 = vpack.c.bf16 %v472_v27, %v471_v30  ;;  %vm1695_vm0 = vcmp.eq.s32.totalorder %v1579_v63, 1  ;;  %1093 = vmatprep.subr.bf16.mxu0 %v1213_v21 }
  0xf5   :  { %v1141_v38 = vpop.eup %1140  ;;  %v366_v40 = vadd.f32 %v969_v34, %v173_v62  ;;  %v360_v41 = vpop.f32.mrb[15].mxu0 }
  0xf6   :  { %v1143_v42 = vpop.eup %1142  ;;  %v361_v43 = vadd.f32 %v360_v41, %v168_v2  ;;  %1074 = vmatprep.subr.bf16.mxu1 %v1073_v35  ;;  %v474_v44 = vsel %vm458_vm9, %v1141_v38, %v336_v4 }
  0xf7   :  { %1152 = vtanh.f32 %v366_v40  ;;  %1076 = vmatpush3.bf16.msra.mxu1 %v1073_v35  ;;  %v473_v45 = vsel %vm457_vm10, %v1143_v42, %v331_v6  ;;  %v484_v6 = vld [vmem:[%s1690_s4 + $0x18] sm:$0xff]  ;;  %v516_v24 = vpop.permute.xlu0 %515 }
  0xf8   :  { %1154 = vtanh.f32 %v361_v43  ;;  %v1077_v46 = vpack.c.bf16 %v474_v44, %v473_v45 }
  0xf9   :  { %v1145_v47 = vpop.eup %1144 }
  0xfa   :  { %v1147_v48 = vpop.eup %1146  ;;  %1078 = vmatprep.subr.bf16.mxu1 %v1077_v46  ;;  %v476_v50 = vsel %vm460_vm11, %v1145_v47, %v346_v12  ;;  %v490_v12 = vld [vmem:[%s1690_s4 + $0x48] sm:$0xff] }
  0xfb   :  { %1080 = vmatpush3.bf16.msra.mxu1 %v1077_v46  ;;  %v475_v54 = vsel %vm459_vm12, %v1147_v48, %v341_v16  ;;  %v493_v16 = vld [vmem:[%s1690_s4 + $0x60] sm:$0xff] }
  0xfc   :  { %v1081_v55 = vpack.c.bf16 %v476_v50, %v475_v54 }
  0xfd   :  { %v1149_v56 = vpop.eup %1148 }
  0xfe   :  { %v1151_v57 = vpop.eup %1150  ;;  %1082 = vmatprep.subr.bf16.mxu1 %v1081_v55  ;;  %v478_v58 = vsel %vm462_vm13, %v1149_v56, %v356_v23  ;;  %v521_v23 = vpop.permute.xlu1 %520 }
  0xff   :  { %1084 = vmatpush3.bf16.msra.mxu1 %v1081_v55  ;;  %v477_v59 = vsel %vm461_vm14, %v1151_v57, %v351_v26  ;;  %v526_v26 = vpop.permute.xlu0 %525 }
 0x100   :  { %v1085_v61 = vpack.c.bf16 %v478_v58, %v477_v59 }
 0x101   :  { %v1153_v62 = vpop.eup %1152 }
 0x102   :  { %v1155_v0 = vpop.eup %1154  ;;  %1086 = vmatprep.subr.bf16.mxu1 %v1085_v61  ;;  %v480_v1 = vsel %vm464_vm15, %v1153_v62, %v366_v40  ;;  %v531_v25 = vpop.permute.xlu1 %530 }
 0x103   :  { %1088 = vmatpush3.bf16.msra.mxu1 %v1085_v61  ;;  %v479_v2 = vsel %vm1695_vm0, %v1155_v0, %v361_v43  ;;  %vm1214_vm0 = vmmov 0   ;;  %v536_v30 = vpop.permute.xlu0 %535 }
 0x104   :  { %v1089_v4 = vpack.c.bf16 %v480_v1, %v479_v2  ;;  %1058 = vmatprep.mubr.msk.f32.mxu0 %vm1214_vm0, %v1215_v22 }
 0x106   :  { %1090 = vmatprep.subr.bf16.mxu1 %v1089_v4  ;;  %v541_v27 = vpop.permute.xlu1 %540 }
 0x107   :  { %1092 = vmatpush3.bf16.msra.mxu1 %v1089_v4  ;;  %v546_v43 = vpop.permute.xlu0 %545 }
 0x10a   :  { %1003 = vmatmul.mubr.f32.vlgmr.msra.gmra.mrb[0].mxu1 %v482_v5  ;;  %v551_v41 = vpop.permute.xlu1 %550 }
 0x10b   :  { %1005 = vmatprep.mubr.f32.mxu1 %v483_v3  ;;  %v556_v56 = vpop.permute.xlu0 %555 }
 0x10e   :  { %1006 = vmatmul.mubr.f32.gmra.mrb[2].mxu1 %v484_v6  ;;  %v561_v54 = vpop.permute.xlu1 %560 }
 0x10f   :  { %1008 = vmatprep.mubr.f32.mxu1 %v485_v7  ;;  %v566_v7 = vpop.permute.xlu0 %565 }
 0x112   :  { %1009 = vmatmul.mubr.f32.gmra.mrb[4].mxu1 %v486_v8  ;;  %v571_v4 = vpop.permute.xlu1 %570 }
 0x113   :  { %1011 = vmatprep.mubr.f32.mxu1 %v487_v9 }
 0x116   :  { %1012 = vmatmul.mubr.f32.gmra.mrb[6].mxu1 %v488_v10 }
 0x117   :  { %1014 = vmatprep.mubr.f32.mxu1 %v489_v11 }
 0x11a   :  { %1015 = vmatmul.mubr.f32.gmra.mrb[8].mxu1 %v490_v12 }
 0x11b   :  { %1017 = vmatprep.mubr.f32.mxu1 %v491_v13 }
 0x11e   :  { %1018 = vmatmul.mubr.f32.gmra.mrb[10].mxu1 %v492_v14 }
 0x11f   :  { %1020 = vmatprep.mubr.f32.mxu1 %v493_v16 }
 0x122   :  { %1021 = vmatmul.mubr.f32.gmra.mrb[12].mxu1 %v494_v17 }
 0x123   :  { %1023 = vmatprep.mubr.f32.mxu1 %v495_v19 }
 0x126   :  { %1024 = vmatmul.mubr.f32.gmra.mrb[14].mxu1 %v496_v20  ;;  %v581_v20 = vpop.permute.xlu1 %580 }
 0x12a   :  { %v591_v37 = vpop.permute.xlu1 %590 }
 0x1dd   :  { %v1004_v34 = vpop.f32.mrb[0].mxu1 }
 0x1de   :  { %v665_v35 = vadd.f32 %v1004_v34, %v521_v23  ;;  %v659_v38 = vpop.f32.mrb[1].mxu1  ;;  %v576_v23 = vpop.permute.xlu0 %575 }
 0x1df   :  { %v660_v40 = vadd.f32 %v659_v38, %v516_v24 }
 0x1e0   :  { %1156 = vtanh.f32 %v665_v35 }
 0x1e1   :  { %1158 = vtanh.f32 %v660_v40  ;;  %v1007_v42 = vpop.f32.mrb[2].mxu1 }
 0x1e2   :  { %v675_v44 = vadd.f32 %v1007_v42, %v531_v25  ;;  %v669_v45 = vpop.f32.mrb[3].mxu1 }
 0x1e3   :  { %v670_v46 = vadd.f32 %v669_v45, %v526_v26 }
 0x1e4   :  { %1160 = vtanh.f32 %v675_v44 }
 0x1e5   :  { %1162 = vtanh.f32 %v670_v46  ;;  %v1010_v47 = vpop.f32.mrb[4].mxu1 }
 0x1e6   :  { %v685_v48 = vadd.f32 %v1010_v47, %v541_v27  ;;  %v679_v50 = vpop.f32.mrb[5].mxu1 }
 0x1e7   :  { %v680_v55 = vadd.f32 %v679_v50, %v536_v30 }
 0x1e8   :  { %1164 = vtanh.f32 %v685_v48 }
 0x1e9   :  { %1166 = vtanh.f32 %v680_v55  ;;  %v1013_v57 = vpop.f32.mrb[6].mxu1 }
 0x1ea   :  { %v1157_v58 = vpop.eup %1156  ;;  %v695_v59 = vadd.f32 %v1013_v57, %v551_v41  ;;  %v689_v61 = vpop.f32.mrb[7].mxu1 }
 0x1eb   :  { %v1159_v62 = vpop.eup %1158  ;;  %v755_v0 = vsel %vm450_vm1, %v1157_v58, %v665_v35  ;;  %v690_v1 = vadd.f32 %v689_v61, %v546_v43  ;;  %v586_v43 = vpop.permute.xlu0 %585  ;;  %vm1696_vm1 = vcmp.eq.s32.totalorder %v1579_v63, 1 }
 0x1ec   :  { %v754_v2 = vsel %vm449_vm2, %v1159_v62, %v660_v40  ;;  %1168 = vtanh.f32 %v695_v59 }
 0x1ed   :  { %v1094_v5 = vpack.c.bf16 %v755_v0, %v754_v2  ;;  %1170 = vtanh.f32 %v690_v1  ;;  %v1016_v3 = vpop.f32.mrb[8].mxu1 }
 0x1ee   :  { %v1161_v6 = vpop.eup %1160  ;;  %v705_v8 = vadd.f32 %v1016_v3, %v561_v54  ;;  %v699_v9 = vpop.f32.mrb[9].mxu1 }
 0x1ef   :  { %v1163_v10 = vpop.eup %1162  ;;  %v757_v11 = vsel %vm452_vm3, %v1161_v6, %v675_v44  ;;  %v700_v12 = vadd.f32 %v699_v9, %v556_v56  ;;  %1095 = vmatpush3.bf16.msra.mxu0 %v1094_v5 }
 0x1f0   :  { %v756_v28 = vsel %vm451_vm4, %v1163_v10, %v670_v46  ;;  %1172 = vtanh.f32 %v705_v8  ;;  %1096 = vmatprep.subr.bf16.mxu0 %v1213_v21 }
 0x1f1   :  { %v1097_v29 = vpack.c.bf16 %v757_v11, %v756_v28  ;;  %1174 = vtanh.f32 %v700_v12  ;;  %v1019_v13 = vpop.f32.mrb[10].mxu1 }
 0x1f2   :  { %v1165_v14 = vpop.eup %1164  ;;  %v715_v16 = vadd.f32 %v1019_v13, %v571_v4  ;;  %v709_v17 = vpop.f32.mrb[11].mxu1 }
 0x1f3   :  { %v1167_v19 = vpop.eup %1166  ;;  %v759_v32 = vsel %vm454_vm5, %v1165_v14, %v685_v48  ;;  %v710_v22 = vadd.f32 %v709_v17, %v566_v7  ;;  %1098 = vmatpush3.bf16.msra.mxu0 %v1097_v29 }
 0x1f4   :  { %v758_v33 = vsel %vm453_vm6, %v1167_v19, %v680_v55  ;;  %1176 = vtanh.f32 %v715_v16  ;;  %1099 = vmatprep.subr.bf16.mxu0 %v1213_v21 }
 0x1f5   :  { %v1100_v24 = vpack.c.bf16 %v759_v32, %v758_v33  ;;  %1178 = vtanh.f32 %v710_v22  ;;  %v1022_v25 = vpop.f32.mrb[12].mxu1 }
 0x1f6   :  { %v1169_v26 = vpop.eup %1168  ;;  %v725_v27 = vadd.f32 %v1022_v25, %v581_v20  ;;  %v719_v30 = vpop.f32.mrb[13].mxu1 }
 0x1f7   :  { %v1171_v34 = vpop.eup %1170  ;;  %v761_v36 = vsel %vm456_vm7, %v1169_v26, %v695_v59  ;;  %v720_v35 = vadd.f32 %v719_v30, %v576_v23  ;;  %1101 = vmatpush3.bf16.msra.mxu0 %v1100_v24 }
 0x1f8   :  { %v760_v38 = vsel %vm455_vm8, %v1171_v34, %v690_v1  ;;  %1180 = vtanh.f32 %v725_v27  ;;  %1102 = vmatprep.subr.bf16.mxu0 %v1213_v21  ;;  %v775_v1 = vpop.permute.xlu0 %774 }
 0x1f9   :  { %v1103_v40 = vpack.c.bf16 %v761_v36, %v760_v38  ;;  %1182 = vtanh.f32 %v720_v35  ;;  %v1025_v41 = vpop.f32.mrb[14].mxu1 }
 0x1fa   :  { %v1173_v42 = vpop.eup %1172  ;;  %v735_v44 = vadd.f32 %v1025_v41, %v591_v37  ;;  %v729_v45 = vpop.f32.mrb[15].mxu1 }
 0x1fb   :  { %v1175_v46 = vpop.eup %1174  ;;  %v763_v51 = vsel %vm458_vm9, %v1173_v42, %v705_v8  ;;  %v730_v47 = vadd.f32 %v729_v45, %v586_v43  ;;  %1104 = vmatpush3.bf16.msra.mxu0 %v1103_v40 }
 0x1fc   :  { %v762_v53 = vsel %vm457_vm10, %v1175_v46, %v700_v12  ;;  %1184 = vtanh.f32 %v735_v44  ;;  %1105 = vmatprep.subr.bf16.mxu0 %v1213_v21 }
 0x1fd   :  { %v1106_v48 = vpack.c.bf16 %v763_v51, %v762_v53  ;;  %1186 = vtanh.f32 %v730_v47 }
 0x1fe   :  { %v1177_v50 = vpop.eup %1176 }
 0x1ff   :  { %v1179_v54 = vpop.eup %1178  ;;  %v765_v55 = vsel %vm460_vm11, %v1177_v50, %v715_v16  ;;  %1107 = vmatpush3.bf16.msra.mxu0 %v1106_v48 }
 0x200   :  { %v764_v15 = vsel %vm459_vm12, %v1179_v54, %v710_v22  ;;  %1108 = vmatprep.subr.bf16.mxu0 %v1213_v21 }
 0x201   :  { %v1109_v56 = vpack.c.bf16 %v765_v55, %v764_v15 }
 0x202   :  { %v1181_v57 = vpop.eup %1180 }
 0x203   :  { %v1183_v18 = vpop.eup %1182  ;;  %v767_v58 = vsel %vm462_vm13, %v1181_v57, %v725_v27  ;;  %1110 = vmatpush3.bf16.msra.mxu0 %v1109_v56 }
 0x204   :  { %v766_v59 = vsel %vm461_vm14, %v1183_v18, %v720_v35  ;;  %1111 = vmatprep.subr.bf16.mxu0 %v1213_v21 }
 0x205   :  { %v1112_v31 = vpack.c.bf16 %v767_v58, %v766_v59 }
 0x206   :  { %v1185_v61 = vpop.eup %1184 }
 0x207   :  { %v1187_v62 = vpop.eup %1186  ;;  %v769_v39 = vsel %vm464_vm15, %v1185_v61, %v735_v44  ;;  %1113 = vmatpush3.bf16.msra.mxu0 %v1112_v31 }
 0x208   :  { %v768_v0 = vsel %vm1696_vm1, %v1187_v62, %v730_v47  ;;  %1114 = vmatprep.subr.bf16.mxu0 %v1213_v21 }
 0x209   :  { %v1115_v49 = vpack.c.bf16 %v769_v39, %v768_v0 }
 0x20b   :  { %1116 = vmatpush3.bf16.msra.mxu0 %v1115_v49 }
 0x20e   :  { %1059 = vmatmul.mubr.f32.vlgmr.msra.gmra.mrb[16].mxu0 %v770_v52 }
 0x2e1   :  { %v843_v2 = vpop.f32.mrb[16].mxu0 }
 0x2e2   :  { %v844_v4 = vadd.f32 %v843_v2, %v775_v1  ;;  %v1060_v60 = vpop.f32.mrb[17].mxu0 }
 0x2e4   :  { %847 = vst [vmem:[#allocation2] sm:$0xff] %v844_v4 }
 0x2e5   :  { %1199 = shalt.err (!%p1196_p4)
}
 0x2e6   :  { %s1200_s6 = scalar_lea.hbm %s1694_s8, 128 }
 0x2e7   :  { %p1201_p5 = scmp.ne.s32.totalorder %s1694_s8, %s1200_s6  ;;  %p1204_p6 = scmp.lt.u32.totalorder %s1200_s6, %s1694_s8 }
 0x2e9   :  { %p1206_p7 = pnand %p1204_p6, %p1201_p5 }
 0x2eb   :  { %1209 = shalt.err (!%p1206_p7)
}
 0x2ec   :  { %857 = dma.vmem_to_hbm [thread:$0]  %s855_s18, 128, %s1694_s8, [#allocation3]  }
 0x2ed   :  { %1210 = dma.done.wait [#allocation3], 128  }
 0x2ee   :  { %1211 = vsyncadd [#allocation3], 4294967168 }
 0x2ef   :  { %861 = vsyncpa [#allocation3], 1 }

</bundles_post_ra>
